<compile_context>
chip_gen: v7x
topology: tpu7x:2x2x1
jax: 0.10.0
libtpu: 0.0.40
codegen_flags: <defaults>
</compile_context>

<pallas_src>
import math
from functools import partial

import jax
import jax.numpy as jnp
from jax import lax
from jax.experimental import pallas as pl
from jax.experimental.pallas import tpu as pltpu  # noqa: F401 (CompilerParams when scaled up)

# ----------------------- model config (small, synthetic) -----------------------
BATCH = 2
SEQ = 8
HIDDEN = 32
FFN = 64
VOCAB = 64
N_CLS = 3                 # classification_head = nn.Linear(hidden, 3)
N_NER = 5                 # ner_head            = nn.Linear(hidden, 5)
N_HEADS = N_NER + N_CLS   # fused head width = 8

LANE = 128                # TPU lane width
QKV_W = 3 * LANE          # fused QKV weight width: Q|K|V, each 128-lane aligned
OUT_W = LANE              # lane-dense head-output width

# rows of the packed f32 vector-param slab pvec: (9, 384)
_R_BQKV = 0   # (1, 384)  bq @ lanes 0:32, bk @ 128:160, bv @ 256:288
_R_BO = 1     # lanes 0:H
_R_LN1G = 2
_R_LN1B = 3
_R_LN2G = 4
_R_LN2B = 5
_R_B2 = 6
_R_B1 = 7     # lanes 0:FFN
_R_BHD = 8    # lanes 0:8 (rest zero)


def _layer_norm(x, gamma, beta, eps=1e-5):
    mean = jnp.mean(x, axis=-1, keepdims=True)
    var = jnp.mean((x - mean) ** 2, axis=-1, keepdims=True)
    inv = lax.rsqrt(var + eps)
    return (x - mean) * inv * gamma + beta


def multitask_kernel(ids_ref, mask_ref, tok_ref, pos_ref,
                     wqkv_ref, wo_ref, w1_ref, w2_ref, whd_ref, pv_ref,
                     out_ref):
    B, S = mask_ref.shape
    N = B * S
    H = HIDDEN
    bf = jnp.bfloat16

    pv = pv_ref[...]                                   # (9, 384) f32
    b_qkv = pv[_R_BQKV:_R_BQKV + 1, :]                 # (1, 384)
    b_o = pv[_R_BO:_R_BO + 1, 0:H]
    ln1g = pv[_R_LN1G:_R_LN1G + 1, 0:H]
    ln1b = pv[_R_LN1B:_R_LN1B + 1, 0:H]
    ln2g = pv[_R_LN2G:_R_LN2G + 1, 0:H]
    ln2b = pv[_R_LN2B:_R_LN2B + 1, 0:H]
    b_2 = pv[_R_B2:_R_B2 + 1, 0:H]
    b_1 = pv[_R_B1:_R_B1 + 1, 0:FFN]
    b_hd = pv[_R_BHD:_R_BHD + 1, 0:OUT_W]

    # ---- embedding lookup fused in-kernel: exact f32 one-hot matmul gather ----
    ids = ids_ref[...]                                             # (N, 1) int32
    vocab_iota = lax.broadcasted_iota(jnp.int32, (N, VOCAB), 1)
    onehot = (ids == vocab_iota).astype(jnp.float32)               # (N, VOCAB)
    x = jnp.dot(onehot, tok_ref[...],
                preferred_element_type=jnp.float32) + pos_ref[...]  # (N, H) f32

    # ---- fused QKV projection (Q|K|V each 128-lane aligned, padded lanes are 0) ----
    x_bf = x.astype(bf)
    qkv = jnp.dot(x_bf, wqkv_ref[...],
                  preferred_element_type=jnp.float32) + b_qkv       # (N, 384)
    q2 = qkv[:, 0:LANE]                 # aligned views; lanes H:128 are exactly 0
    k2 = qkv[:, LANE:2 * LANE]
    v2 = qkv[:, 2 * LANE:3 * LANE]

    # ---- additive attention-mask bias built in-kernel from the raw (B, S) mask ----
    bias = (mask_ref[...] - 1.0) * 1e9                              # (B, S): 0 / -1e9

    # ---- self-attention, per batch (no wasted cross-batch quadrants) ----
    scale = 1.0 / math.sqrt(H)
    attn_rows = []
    for b in range(B):                    # B is tiny & static; unrolled
        r0 = b * S                        # S == 8 -> tile-aligned sublane slices
        q_b = q2[r0:r0 + S, :].astype(bf)
        k_b = k2[r0:r0 + S, :].astype(bf)
        v_b = v2[r0:r0 + S, :].astype(bf)
        s_b = jnp.dot(q_b, k_b.T, preferred_element_type=jnp.float32) * scale
        s_b = s_b + bias[b:b + 1, :]                                # (S, S)
        # max-stabilized softmax in f32; denominator reciprocal on the EUP.
        # (a fully-masked row gives a uniform softmax, not NaN, since the additive
        #  bias is finite and the row max is subtracted first.)
        s_b = s_b - jnp.max(s_b, axis=-1, keepdims=True)
        p_b = jnp.exp(s_b)
        p_b = p_b * pl.reciprocal(jnp.sum(p_b, axis=-1, keepdims=True), approx=True)
        attn_rows.append(jnp.dot(p_b.astype(bf), v_b,
                                 preferred_element_type=jnp.float32))  # (S, 128)
    attn = jnp.concatenate(attn_rows, axis=0) if B > 1 else attn_rows[0]  # (N, 128)

    o = jnp.dot(attn.astype(bf), wo_ref[...],
                preferred_element_type=jnp.float32) + b_o            # (N, H)
    y = _layer_norm(x + o, ln1g, ln1b)

    # ---- feed-forward ----
    h = jnp.dot(y.astype(bf), w1_ref[...],
                preferred_element_type=jnp.float32) + b_1            # (N, FFN)
    # TODO(synk): PyTorch nn.GELU() default is exact erf; tanh approximation differs ~1e-3.
    h = jax.nn.gelu(h, approximate=True)
    f = jnp.dot(h.astype(bf), w2_ref[...],
                preferred_element_type=jnp.float32) + b_2
    y2 = _layer_norm(y + f, ln2g, ln2b)                              # last_hidden_state

    # ---- fused heads: one (H, 128) matmul, one lane-dense (N, 128) store ----
    # cols 0:5 = NER logits (every token); cols 5:8 = classification logits
    # (read from the [CLS] rows in the JAX glue); cols 8:128 are zero padding.
    heads = jnp.dot(y2.astype(bf), whd_ref[...],
                    preferred_element_type=jnp.float32) + b_hd
    out_ref[...] = heads                                             # (N, 128)


# ----------------------- one-time weight / bias packing -----------------------
def pack_params(params):
    bf = jnp.bfloat16
    f32 = jnp.float32

    def padl(a, width):                       # zero-pad last (lane) dim to `width`
        return jnp.pad(a, ((0, 0), (0, width - a.shape[-1])))

    # fused QKV weight, each sub-block 128-lane aligned: (H, 384)
    w_qkv = jnp.concatenate(
        [padl(params["wq"], LANE), padl(params["wk"], LANE), padl(params["wv"], LANE)],
        axis=1).astype(bf)
    # W_o padded on the contraction dim to 128 rows (extra rows are zero): (128, H)
    w_o = jnp.pad(params["wo"], ((0, LANE - HIDDEN), (0, 0))).astype(bf)
    w1 = params["w1"].astype(bf)                                   # (H, FFN)
    w2 = params["w2"].astype(bf)                                   # (FFN, H)
    # fused heads, lane-dense: (H, 128), cols 0:5 NER, 5:8 CLS, rest zero
    w_hd = padl(jnp.concatenate([params["wn"], params["wc"]], axis=1), OUT_W).astype(bf)

    b_qkv = jnp.concatenate(
        [padl(params["bq"], LANE), padl(params["bk"], LANE), padl(params["bv"], LANE)],
        axis=1)                                                    # (1, 384)
    b_hd = jnp.concatenate([params["bn"], params["bc"]], axis=1)   # (1, 8)
    rows = [
        b_qkv,
        padl(params["bo"], QKV_W), padl(params["ln1_g"], QKV_W), padl(params["ln1_b"], QKV_W),
        padl(params["ln2_g"], QKV_W), padl(params["ln2_b"], QKV_W), padl(params["b2"], QKV_W),
        padl(params["b1"], QKV_W), padl(b_hd, QKV_W),
    ]
    pvec = jnp.concatenate(rows, axis=0).astype(f32)               # (9, 384)

    return {
        "tok_emb": params["tok_emb"].astype(f32),                  # (VOCAB, H)
        "pos_emb": jnp.tile(params["pos_emb"], (BATCH, 1)).astype(f32),  # (B*S, H)
        "w_qkv": w_qkv, "w_o": w_o, "w1": w1, "w2": w2, "w_hd": w_hd,
        "pvec": pvec,
    }


def multitask_forward(input_ids, attention_mask, packed):
    B, S = input_ids.shape

    ids = input_ids.astype(jnp.int32).reshape(B * S, 1)
    mask = attention_mask.astype(jnp.float32)                      # raw (B, S) mask

    # Single gridless invocation: the whole working set is a few tens of KB, so no
    # grid / per-step pipeline overhead; every ref lands in VMEM once.
    out = pl.pallas_call(
        multitask_kernel,
        out_shape=jax.ShapeDtypeStruct((B * S, OUT_W), jnp.float32),
    )(ids, mask, packed["tok_emb"], packed["pos_emb"],
      packed["w_qkv"], packed["w_o"], packed["w1"], packed["w2"],
      packed["w_hd"], packed["pvec"])

    out3 = out.reshape(B, S, OUT_W)
    ner_logits = out3[:, :, 0:N_NER]                               # (B, S, 5)
    classification_logits = out3[:, 0, N_NER:N_NER + N_CLS]        # (B, 3) from [CLS]
    return classification_logits, ner_logits


def init_params(key):
    ks = jax.random.split(key, 16)
    std = 0.02
    return {
        "tok_emb": std * jax.random.normal(ks[0], (VOCAB, HIDDEN), jnp.float32),
        "pos_emb": std * jax.random.normal(ks[1], (SEQ, HIDDEN), jnp.float32),
        "wq": std * jax.random.normal(ks[2], (HIDDEN, HIDDEN), jnp.float32),
        "wk": std * jax.random.normal(ks[3], (HIDDEN, HIDDEN), jnp.float32),
        "wv": std * jax.random.normal(ks[4], (HIDDEN, HIDDEN), jnp.float32),
        "wo": std * jax.random.normal(ks[5], (HIDDEN, HIDDEN), jnp.float32),
        "w1": std * jax.random.normal(ks[6], (HIDDEN, FFN), jnp.float32),
        "w2": std * jax.random.normal(ks[7], (FFN, HIDDEN), jnp.float32),
        "wc": std * jax.random.normal(ks[8], (HIDDEN, N_CLS), jnp.float32),
        "wn": std * jax.random.normal(ks[9], (HIDDEN, N_NER), jnp.float32),
        "bq": jnp.zeros((1, HIDDEN), jnp.float32),
        "bk": jnp.zeros((1, HIDDEN), jnp.float32),
        "bv": jnp.zeros((1, HIDDEN), jnp.float32),
        "bo": jnp.zeros((1, HIDDEN), jnp.float32),
        "b1": jnp.zeros((1, FFN), jnp.float32),
        "b2": jnp.zeros((1, HIDDEN), jnp.float32),
        "bc": jnp.zeros((1, N_CLS), jnp.float32),
        "bn": jnp.zeros((1, N_NER), jnp.float32),
        "ln1_g": jnp.ones((1, HIDDEN), jnp.float32),
        "ln1_b": jnp.zeros((1, HIDDEN), jnp.float32),
        "ln2_g": jnp.ones((1, HIDDEN), jnp.float32),
        "ln2_b": jnp.zeros((1, HIDDEN), jnp.float32),
    }


if __name__ == "__main__":
    key = jax.random.PRNGKey(0)
    pkey, ikey = jax.random.split(key)
    params = init_params(pkey)
    packed = pack_params(params)          # packing hoisted out of the per-call path

    input_ids = jax.random.randint(ikey, (BATCH, SEQ), 0, VOCAB, dtype=jnp.int32)
    # mask out the last two tokens of the second sequence
    attention_mask = jnp.array(
        [[1] * SEQ, [1] * (SEQ - 2) + [0, 0]], dtype=jnp.int32
    )

    fwd = jax.jit(partial(multitask_forward, packed=packed))
    cls_logits, ner_logits = fwd(input_ids, attention_mask)
    jax.block_until_ready((cls_logits, ner_logits))

    assert cls_logits.shape == (BATCH, N_CLS)
    assert ner_logits.shape == (BATCH, SEQ, N_NER)
    assert bool(jnp.all(jnp.isfinite(cls_logits))) and bool(jnp.all(jnp.isfinite(ner_logits)))
    print("KERNEL_OK")
</pallas_src>

<mosaic_0001>
module attributes {stable_mosaic.version = 11 : i64} {
  func.func @multitask_kernel(%arg0: memref<16x1xi32, #tpu.memory_space<vmem>>, %arg1: memref<2x8xf32, #tpu.memory_space<vmem>>, %arg2: memref<64x32xf32, #tpu.memory_space<vmem>>, %arg3: memref<16x32xf32, #tpu.memory_space<vmem>>, %arg4: memref<32x384xbf16, #tpu.memory_space<vmem>>, %arg5: memref<128x32xbf16, #tpu.memory_space<vmem>>, %arg6: memref<32x64xbf16, #tpu.memory_space<vmem>>, %arg7: memref<64x32xbf16, #tpu.memory_space<vmem>>, %arg8: memref<32x128xbf16, #tpu.memory_space<vmem>>, %arg9: memref<9x384xf32, #tpu.memory_space<vmem>>, %arg10: memref<16x128xf32, #tpu.memory_space<vmem>>) attributes {dimension_semantics = [], scalar_prefetch = 0 : i64, scratch_operands = 0 : i64, tpu.core_type = #tpu.core_type<tc>} {
    %c0 = arith.constant 0 : index
    %c0_0 = arith.constant 0 : index
    %0 = vector.load %arg9[%c0, %c0_0] : memref<9x384xf32, #tpu.memory_space<vmem>>, vector<9x384xf32>
    %1 = vector.extract_strided_slice %0 {offsets = [0, 0], sizes = [1, 384], strides = [1, 1]} : vector<9x384xf32> to vector<1x384xf32>
    %2 = vector.extract_strided_slice %0 {offsets = [1, 0], sizes = [1, 32], strides = [1, 1]} : vector<9x384xf32> to vector<1x32xf32>
    %3 = vector.extract_strided_slice %0 {offsets = [2, 0], sizes = [1, 32], strides = [1, 1]} : vector<9x384xf32> to vector<1x32xf32>
    %4 = vector.extract_strided_slice %0 {offsets = [3, 0], sizes = [1, 32], strides = [1, 1]} : vector<9x384xf32> to vector<1x32xf32>
    %5 = vector.extract_strided_slice %0 {offsets = [4, 0], sizes = [1, 32], strides = [1, 1]} : vector<9x384xf32> to vector<1x32xf32>
    %6 = vector.extract_strided_slice %0 {offsets = [5, 0], sizes = [1, 32], strides = [1, 1]} : vector<9x384xf32> to vector<1x32xf32>
    %7 = vector.extract_strided_slice %0 {offsets = [6, 0], sizes = [1, 32], strides = [1, 1]} : vector<9x384xf32> to vector<1x32xf32>
    %8 = vector.extract_strided_slice %0 {offsets = [7, 0], sizes = [1, 64], strides = [1, 1]} : vector<9x384xf32> to vector<1x64xf32>
    %9 = vector.extract_strided_slice %0 {offsets = [8, 0], sizes = [1, 128], strides = [1, 1]} : vector<9x384xf32> to vector<1x128xf32>
    %c0_1 = arith.constant 0 : index
    %c0_2 = arith.constant 0 : index
    %10 = vector.load %arg0[%c0_1, %c0_2] : memref<16x1xi32, #tpu.memory_space<vmem>>, vector<16x1xi32>
    %11 = tpu.iota {dimensions = array<i32: 1>} : vector<16x64xi32>
    %12 = vector.broadcast %10 : vector<16x1xi32> to vector<16x64xi32>
    %13 = arith.cmpi eq, %12, %11 : vector<16x64xi32>
    %14 = arith.extui %13 : vector<16x64xi1> to vector<16x64xi32>
    %15 = arith.sitofp %14 : vector<16x64xi32> to vector<16x64xf32>
    %c0_3 = arith.constant 0 : index
    %c0_4 = arith.constant 0 : index
    %16 = vector.load %arg2[%c0_3, %c0_4] : memref<64x32xf32, #tpu.memory_space<vmem>>, vector<64x32xf32>
    %cst = arith.constant dense<0.000000e+00> : vector<16x32xf32>
    %17 = tpu.matmul %15, %16, %cst {dimension_numbers = #tpu.dot_dimension_numbers<[1], [0], [0], [1], [0, 0, 1, 1], [], []>} : vector<16x64xf32>, vector<64x32xf32>, vector<16x32xf32> -> vector<16x32xf32>
    %c0_5 = arith.constant 0 : index
    %c0_6 = arith.constant 0 : index
    %18 = vector.load %arg3[%c0_5, %c0_6] : memref<16x32xf32, #tpu.memory_space<vmem>>, vector<16x32xf32>
    %19 = arith.addf %17, %18 : vector<16x32xf32>
    %20 = arith.truncf %19 : vector<16x32xf32> to vector<16x32xbf16>
    %c0_7 = arith.constant 0 : index
    %c0_8 = arith.constant 0 : index
    %21 = vector.load %arg4[%c0_7, %c0_8] : memref<32x384xbf16, #tpu.memory_space<vmem>>, vector<32x384xbf16>
    %cst_9 = arith.constant dense<0.000000e+00> : vector<16x384xf32>
    %22 = tpu.matmul %20, %21, %cst_9 {dimension_numbers = #tpu.dot_dimension_numbers<[1], [0], [0], [1], [0, 0, 1, 1], [], []>} : vector<16x32xbf16>, vector<32x384xbf16>, vector<16x384xf32> -> vector<16x384xf32>
    %23 = vector.broadcast %1 : vector<1x384xf32> to vector<16x384xf32>
    %24 = arith.addf %22, %23 : vector<16x384xf32>
    %25 = vector.extract_strided_slice %24 {offsets = [0, 0], sizes = [16, 128], strides = [1, 1]} : vector<16x384xf32> to vector<16x128xf32>
    %26 = vector.extract_strided_slice %24 {offsets = [0, 128], sizes = [16, 128], strides = [1, 1]} : vector<16x384xf32> to vector<16x128xf32>
    %27 = vector.extract_strided_slice %24 {offsets = [0, 256], sizes = [16, 128], strides = [1, 1]} : vector<16x384xf32> to vector<16x128xf32>
    %c0_10 = arith.constant 0 : index
    %c0_11 = arith.constant 0 : index
    %28 = vector.load %arg1[%c0_10, %c0_11] : memref<2x8xf32, #tpu.memory_space<vmem>>, vector<2x8xf32>
    %cst_12 = arith.constant 1.000000e+00 : f32
    %29 = vector.broadcast %cst_12 : f32 to vector<2x8xf32>
    %30 = arith.subf %28, %29 : vector<2x8xf32>
    %cst_13 = arith.constant 1.000000e+09 : f32
    %31 = vector.broadcast %cst_13 : f32 to vector<2x8xf32>
    %32 = arith.mulf %30, %31 : vector<2x8xf32>
    %33 = vector.extract_strided_slice %25 {offsets = [0, 0], sizes = [8, 128], strides = [1, 1]} : vector<16x128xf32> to vector<8x128xf32>
    %34 = arith.truncf %33 : vector<8x128xf32> to vector<8x128xbf16>
    %35 = vector.extract_strided_slice %26 {offsets = [0, 0], sizes = [8, 128], strides = [1, 1]} : vector<16x128xf32> to vector<8x128xf32>
    %36 = arith.truncf %35 : vector<8x128xf32> to vector<8x128xbf16>
    %37 = vector.extract_strided_slice %27 {offsets = [0, 0], sizes = [8, 128], strides = [1, 1]} : vector<16x128xf32> to vector<8x128xf32>
    %38 = arith.truncf %37 : vector<8x128xf32> to vector<8x128xbf16>
    %39 = tpu.transpose %36, [1, 0] : vector<8x128xbf16> -> vector<128x8xbf16>
    %cst_14 = arith.constant dense<0.000000e+00> : vector<8x8xf32>
    %40 = tpu.matmul %34, %39, %cst_14 {dimension_numbers = #tpu.dot_dimension_numbers<[1], [0], [0], [1], [0, 0, 1, 1], [], []>} : vector<8x128xbf16>, vector<128x8xbf16>, vector<8x8xf32> -> vector<8x8xf32>
    %cst_15 = arith.constant 0.176776692 : f32
    %41 = vector.broadcast %cst_15 : f32 to vector<8x8xf32>
    %42 = arith.mulf %40, %41 : vector<8x8xf32>
    %43 = vector.extract_strided_slice %32 {offsets = [0, 0], sizes = [1, 8], strides = [1, 1]} : vector<2x8xf32> to vector<1x8xf32>
    %44 = vector.broadcast %43 : vector<1x8xf32> to vector<8x8xf32>
    %45 = arith.addf %42, %44 : vector<8x8xf32>
    %cst_16 = arith.constant dense<0xFF800000> : vector<8xf32>
    %46 = vector.multi_reduction <maximumf>, %45, %cst_16 [1] : vector<8x8xf32> to vector<8xf32>
    %47 = vector.shape_cast %46 : vector<8xf32> to vector<8x1xf32>
    %48 = vector.broadcast %47 : vector<8x1xf32> to vector<8x8xf32>
    %49 = arith.subf %45, %48 : vector<8x8xf32>
    %50 = math.exp %49 : vector<8x8xf32>
    %cst_17 = arith.constant dense<0.000000e+00> : vector<8xf32>
    %51 = vector.multi_reduction <add>, %50, %cst_17 [1] : vector<8x8xf32> to vector<8xf32>
    %52 = vector.shape_cast %51 : vector<8xf32> to vector<8x1xf32>
    %53 = tpu.reciprocal %52 {approx = true} : vector<8x1xf32> -> vector<8x1xf32>
    %54 = vector.broadcast %53 : vector<8x1xf32> to vector<8x8xf32>
    %55 = arith.mulf %50, %54 : vector<8x8xf32>
    %56 = arith.truncf %55 : vector<8x8xf32> to vector<8x8xbf16>
    %cst_18 = arith.constant dense<0.000000e+00> : vector<8x128xf32>
    %57 = tpu.matmul %56, %38, %cst_18 {dimension_numbers = #tpu.dot_dimension_numbers<[1], [0], [0], [1], [0, 0, 1, 1], [], []>} : vector<8x8xbf16>, vector<8x128xbf16>, vector<8x128xf32> -> vector<8x128xf32>
    %58 = vector.extract_strided_slice %25 {offsets = [8, 0], sizes = [8, 128], strides = [1, 1]} : vector<16x128xf32> to vector<8x128xf32>
    %59 = arith.truncf %58 : vector<8x128xf32> to vector<8x128xbf16>
    %60 = vector.extract_strided_slice %26 {offsets = [8, 0], sizes = [8, 128], strides = [1, 1]} : vector<16x128xf32> to vector<8x128xf32>
    %61 = arith.truncf %60 : vector<8x128xf32> to vector<8x128xbf16>
    %62 = vector.extract_strided_slice %27 {offsets = [8, 0], sizes = [8, 128], strides = [1, 1]} : vector<16x128xf32> to vector<8x128xf32>
    %63 = arith.truncf %62 : vector<8x128xf32> to vector<8x128xbf16>
    %64 = tpu.transpose %61, [1, 0] : vector<8x128xbf16> -> vector<128x8xbf16>
    %cst_19 = arith.constant dense<0.000000e+00> : vector<8x8xf32>
    %65 = tpu.matmul %59, %64, %cst_19 {dimension_numbers = #tpu.dot_dimension_numbers<[1], [0], [0], [1], [0, 0, 1, 1], [], []>} : vector<8x128xbf16>, vector<128x8xbf16>, vector<8x8xf32> -> vector<8x8xf32>
    %cst_20 = arith.constant 0.176776692 : f32
    %66 = vector.broadcast %cst_20 : f32 to vector<8x8xf32>
    %67 = arith.mulf %65, %66 : vector<8x8xf32>
    %68 = vector.extract_strided_slice %32 {offsets = [1, 0], sizes = [1, 8], strides = [1, 1]} : vector<2x8xf32> to vector<1x8xf32>
    %69 = vector.broadcast %68 : vector<1x8xf32> to vector<8x8xf32>
    %70 = arith.addf %67, %69 : vector<8x8xf32>
    %cst_21 = arith.constant dense<0xFF800000> : vector<8xf32>
    %71 = vector.multi_reduction <maximumf>, %70, %cst_21 [1] : vector<8x8xf32> to vector<8xf32>
    %72 = vector.shape_cast %71 : vector<8xf32> to vector<8x1xf32>
    %73 = vector.broadcast %72 : vector<8x1xf32> to vector<8x8xf32>
    %74 = arith.subf %70, %73 : vector<8x8xf32>
    %75 = math.exp %74 : vector<8x8xf32>
    %cst_22 = arith.constant dense<0.000000e+00> : vector<8xf32>
    %76 = vector.multi_reduction <add>, %75, %cst_22 [1] : vector<8x8xf32> to vector<8xf32>
    %77 = vector.shape_cast %76 : vector<8xf32> to vector<8x1xf32>
    %78 = tpu.reciprocal %77 {approx = true} : vector<8x1xf32> -> vector<8x1xf32>
    %79 = vector.broadcast %78 : vector<8x1xf32> to vector<8x8xf32>
    %80 = arith.mulf %75, %79 : vector<8x8xf32>
    %81 = arith.truncf %80 : vector<8x8xf32> to vector<8x8xbf16>
    %cst_23 = arith.constant dense<0.000000e+00> : vector<8x128xf32>
    %82 = tpu.matmul %81, %63, %cst_23 {dimension_numbers = #tpu.dot_dimension_numbers<[1], [0], [0], [1], [0, 0, 1, 1], [], []>} : vector<8x8xbf16>, vector<8x128xbf16>, vector<8x128xf32> -> vector<8x128xf32>
    %83 = tpu.concatenate %57, %82 in 0 : vector<8x128xf32>, vector<8x128xf32> -> vector<16x128xf32>
    %84 = arith.truncf %83 : vector<16x128xf32> to vector<16x128xbf16>
    %c0_24 = arith.constant 0 : index
    %c0_25 = arith.constant 0 : index
    %85 = vector.load %arg5[%c0_24, %c0_25] : memref<128x32xbf16, #tpu.memory_space<vmem>>, vector<128x32xbf16>
    %cst_26 = arith.constant dense<0.000000e+00> : vector<16x32xf32>
    %86 = tpu.matmul %84, %85, %cst_26 {dimension_numbers = #tpu.dot_dimension_numbers<[1], [0], [0], [1], [0, 0, 1, 1], [], []>} : vector<16x128xbf16>, vector<128x32xbf16>, vector<16x32xf32> -> vector<16x32xf32>
    %87 = vector.broadcast %2 : vector<1x32xf32> to vector<16x32xf32>
    %88 = arith.addf %86, %87 : vector<16x32xf32>
    %89 = arith.addf %19, %88 : vector<16x32xf32>
    %cst_27 = arith.constant dense<0.000000e+00> : vector<16xf32>
    %90 = vector.multi_reduction <add>, %89, %cst_27 [1] : vector<16x32xf32> to vector<16xf32>
    %91 = vector.shape_cast %90 : vector<16xf32> to vector<16x1xf32>
    %cst_28 = arith.constant 3.200000e+01 : f32
    %92 = vector.broadcast %cst_28 : f32 to vector<16x1xf32>
    %93 = arith.divf %91, %92 : vector<16x1xf32>
    %94 = vector.broadcast %93 : vector<16x1xf32> to vector<16x32xf32>
    %95 = arith.subf %89, %94 : vector<16x32xf32>
    %96 = arith.mulf %95, %95 : vector<16x32xf32>
    %cst_29 = arith.constant dense<0.000000e+00> : vector<16xf32>
    %97 = vector.multi_reduction <add>, %96, %cst_29 [1] : vector<16x32xf32> to vector<16xf32>
    %98 = vector.shape_cast %97 : vector<16xf32> to vector<16x1xf32>
    %cst_30 = arith.constant 3.200000e+01 : f32
    %99 = vector.broadcast %cst_30 : f32 to vector<16x1xf32>
    %100 = arith.divf %98, %99 : vector<16x1xf32>
    %cst_31 = arith.constant 9.99999974E-6 : f32
    %101 = vector.broadcast %cst_31 : f32 to vector<16x1xf32>
    %102 = arith.addf %100, %101 : vector<16x1xf32>
    %103 = math.rsqrt %102 : vector<16x1xf32>
    %104 = vector.broadcast %93 : vector<16x1xf32> to vector<16x32xf32>
    %105 = arith.subf %89, %104 : vector<16x32xf32>
    %106 = vector.broadcast %103 : vector<16x1xf32> to vector<16x32xf32>
    %107 = arith.mulf %105, %106 : vector<16x32xf32>
    %108 = vector.broadcast %3 : vector<1x32xf32> to vector<16x32xf32>
    %109 = arith.mulf %107, %108 : vector<16x32xf32>
    %110 = vector.broadcast %4 : vector<1x32xf32> to vector<16x32xf32>
    %111 = arith.addf %109, %110 : vector<16x32xf32>
    %112 = arith.truncf %111 : vector<16x32xf32> to vector<16x32xbf16>
    %c0_32 = arith.constant 0 : index
    %c0_33 = arith.constant 0 : index
    %113 = vector.load %arg6[%c0_32, %c0_33] : memref<32x64xbf16, #tpu.memory_space<vmem>>, vector<32x64xbf16>
    %cst_34 = arith.constant dense<0.000000e+00> : vector<16x64xf32>
    %114 = tpu.matmul %112, %113, %cst_34 {dimension_numbers = #tpu.dot_dimension_numbers<[1], [0], [0], [1], [0, 0, 1, 1], [], []>} : vector<16x32xbf16>, vector<32x64xbf16>, vector<16x64xf32> -> vector<16x64xf32>
    %115 = vector.broadcast %8 : vector<1x64xf32> to vector<16x64xf32>
    %116 = arith.addf %114, %115 : vector<16x64xf32>
    %117 = arith.mulf %116, %116 : vector<16x64xf32>
    %118 = arith.mulf %116, %117 : vector<16x64xf32>
    %cst_35 = arith.constant 4.471500e-02 : f32
    %119 = vector.broadcast %cst_35 : f32 to vector<16x64xf32>
    %120 = arith.mulf %119, %118 : vector<16x64xf32>
    %121 = arith.addf %116, %120 : vector<16x64xf32>
    %cst_36 = arith.constant 0.797884583 : f32
    %122 = vector.broadcast %cst_36 : f32 to vector<16x64xf32>
    %123 = arith.mulf %122, %121 : vector<16x64xf32>
    %124 = math.tanh %123 : vector<16x64xf32>
    %cst_37 = arith.constant 1.000000e+00 : f32
    %125 = vector.broadcast %cst_37 : f32 to vector<16x64xf32>
    %126 = arith.addf %125, %124 : vector<16x64xf32>
    %cst_38 = arith.constant 5.000000e-01 : f32
    %127 = vector.broadcast %cst_38 : f32 to vector<16x64xf32>
    %128 = arith.mulf %127, %126 : vector<16x64xf32>
    %129 = arith.mulf %116, %128 : vector<16x64xf32>
    %130 = arith.truncf %129 : vector<16x64xf32> to vector<16x64xbf16>
    %c0_39 = arith.constant 0 : index
    %c0_40 = arith.constant 0 : index
    %131 = vector.load %arg7[%c0_39, %c0_40] : memref<64x32xbf16, #tpu.memory_space<vmem>>, vector<64x32xbf16>
    %cst_41 = arith.constant dense<0.000000e+00> : vector<16x32xf32>
    %132 = tpu.matmul %130, %131, %cst_41 {dimension_numbers = #tpu.dot_dimension_numbers<[1], [0], [0], [1], [0, 0, 1, 1], [], []>} : vector<16x64xbf16>, vector<64x32xbf16>, vector<16x32xf32> -> vector<16x32xf32>
    %133 = vector.broadcast %7 : vector<1x32xf32> to vector<16x32xf32>
    %134 = arith.addf %132, %133 : vector<16x32xf32>
    %135 = arith.addf %111, %134 : vector<16x32xf32>
    %cst_42 = arith.constant dense<0.000000e+00> : vector<16xf32>
    %136 = vector.multi_reduction <add>, %135, %cst_42 [1] : vector<16x32xf32> to vector<16xf32>
    %137 = vector.shape_cast %136 : vector<16xf32> to vector<16x1xf32>
    %cst_43 = arith.constant 3.200000e+01 : f32
    %138 = vector.broadcast %cst_43 : f32 to vector<16x1xf32>
    %139 = arith.divf %137, %138 : vector<16x1xf32>
    %140 = vector.broadcast %139 : vector<16x1xf32> to vector<16x32xf32>
    %141 = arith.subf %135, %140 : vector<16x32xf32>
    %142 = arith.mulf %141, %141 : vector<16x32xf32>
    %cst_44 = arith.constant dense<0.000000e+00> : vector<16xf32>
    %143 = vector.multi_reduction <add>, %142, %cst_44 [1] : vector<16x32xf32> to vector<16xf32>
    %144 = vector.shape_cast %143 : vector<16xf32> to vector<16x1xf32>
    %cst_45 = arith.constant 3.200000e+01 : f32
    %145 = vector.broadcast %cst_45 : f32 to vector<16x1xf32>
    %146 = arith.divf %144, %145 : vector<16x1xf32>
    %cst_46 = arith.constant 9.99999974E-6 : f32
    %147 = vector.broadcast %cst_46 : f32 to vector<16x1xf32>
    %148 = arith.addf %146, %147 : vector<16x1xf32>
    %149 = math.rsqrt %148 : vector<16x1xf32>
    %150 = vector.broadcast %139 : vector<16x1xf32> to vector<16x32xf32>
    %151 = arith.subf %135, %150 : vector<16x32xf32>
    %152 = vector.broadcast %149 : vector<16x1xf32> to vector<16x32xf32>
    %153 = arith.mulf %151, %152 : vector<16x32xf32>
    %154 = vector.broadcast %5 : vector<1x32xf32> to vector<16x32xf32>
    %155 = arith.mulf %153, %154 : vector<16x32xf32>
    %156 = vector.broadcast %6 : vector<1x32xf32> to vector<16x32xf32>
    %157 = arith.addf %155, %156 : vector<16x32xf32>
    %158 = arith.truncf %157 : vector<16x32xf32> to vector<16x32xbf16>
    %c0_47 = arith.constant 0 : index
    %c0_48 = arith.constant 0 : index
    %159 = vector.load %arg8[%c0_47, %c0_48] : memref<32x128xbf16, #tpu.memory_space<vmem>>, vector<32x128xbf16>
    %cst_49 = arith.constant dense<0.000000e+00> : vector<16x128xf32>
    %160 = tpu.matmul %158, %159, %cst_49 {dimension_numbers = #tpu.dot_dimension_numbers<[1], [0], [0], [1], [0, 0, 1, 1], [], []>} : vector<16x32xbf16>, vector<32x128xbf16>, vector<16x128xf32> -> vector<16x128xf32>
    %161 = vector.broadcast %9 : vector<1x128xf32> to vector<16x128xf32>
    %162 = arith.addf %160, %161 : vector<16x128xf32>
    %c0_50 = arith.constant 0 : index
    %c0_51 = arith.constant 0 : index
    %163 = vector.load %arg10[%c0_50, %c0_51] : memref<16x128xf32, #tpu.memory_space<vmem>>, vector<16x128xf32>
    tpu.vector_store %arg10[%c0_50, %c0_51], %162 {strides = array<i32>} : memref<16x128xf32, #tpu.memory_space<vmem>>, vector<16x128xf32>,
    return
  }
}

</mosaic_0001>

<bundles_post_ra>
// kernel: multitask_forward.1
= control target key start
LH: loop header
LB: loop body
LE: loop exit
PB: predicated region body
PF: predicated region fallthrough
CT: control target
= control target key end

     0   :  { %15 = vsyncpa [#allocation3], 0  ;;  %s1655_s0 = inlined_call_operand.vmem [shape: s32[16,1], index: 0, kind: input, shape index: {}]   ;;  %s1656_s1 = inlined_call_operand.vmem [shape: f32[2,8], index: 1, kind: input, shape index: {}]   ;;  %s1657_s2 = inlined_call_operand.vmem [shape: f32[64,32], index: 2, kind: input, shape index: {}]   ;;  %s1658_s3 = inlined_call_operand.hbm [shape: f32[16,32], index: 3, kind: input, shape index: {}]   ;;  %s1659_s4 = inlined_call_operand.vmem [shape: bf16[32,384], index: 4, kind: input, shape index: {}]   ;;  %s1660_s5 = inlined_call_operand.vmem [shape: bf16[128,32], index: 5, kind: input, shape index: {}]   ;;  %s1661_s6 = inlined_call_operand.hbm [shape: bf16[32,64], index: 6, kind: input, shape index: {}]   ;;  %s1662_s7 = inlined_call_operand.vmem [shape: bf16[64,32], index: 7, kind: input, shape index: {}]   ;;  %s1663_s8 = inlined_call_operand.hbm [shape: bf16[32,128], index: 8, kind: input, shape index: {}]   ;;  %s1664_s9 = inlined_call_operand.hbm [shape: f32[9,384], index: 9, kind: input, shape index: {}]   ;;  %s1665_s10 = inlined_call_operand.vmem [shape: f32[16,128], index: 10, kind: output, shape index: {}]  }
   0x1   :  { %16 = vsyncpa [#allocation5], 0 }
   0x2   :  { %17 = vsyncpa [#allocation8], 0  ;;  %s1335_s13 = smov [#allocation4]   ;;  %s1241_s17 = scalar_lea.hbm %s1661_s6, 256 }
   0x3   :  { %s45_s14 = sshll.u32 %s1335_s13, 4  ;;  %p1242_p0 = scmp.ne.s32.totalorder %s1661_s6, %s1241_s17  ;;  %s46_s14 = int_to_ptr.vmem [resolvable:$true] %s45_s14 }
   0x4   :  { %p1245_p1 = scmp.lt.u32.totalorder %s1241_s17, %s1661_s6 }
   0x6   :  { %p1247_p2 = pnand %p1245_p1, %p1242_p0 }
   0x8   :  { %1250 = shalt.err (!%p1247_p2)
}
   0x9   :  { %s1251_s22 = scalar_lea.vmem %s46_s14, 256  ;;  %p1256_p4 = scmp.lt.s32.totalorder %s46_s14, %s46_s14 }
   0xa   :  { %p1252_p3 = scmp.ne.s32.totalorder %s46_s14, %s1251_s22  ;;  %p1257_p5 = scmp.lt.s32.totalorder %s1251_s22, %s1251_s22 }
   0xc   :  { %p1258_p6 = por %p1257_p5, %p1256_p4 }
   0xe   :  { %p1259_p7 = pnand %p1258_p6, %p1252_p3 }
  0x10   :  { %1262 = shalt.err (!%p1259_p7)
}
  0x11   :  { %s1336_s23 = smov 64   ;;  %s1337_s24 = smov 4  }
  0x12   :  { %51 = dma.hbm_to_vmem [thread:$0]  %s1661_s6, 256, %s46_s14, [#allocation5], %s1336_s23, %s1336_s23, %s1337_s24  }
  0x13   :  { %s1338_s27 = smov [#allocation2]   ;;  %s1263_s11 = scalar_lea.hbm %s1658_s3, 256 }
  0x14   :  { %s29_s28 = sshll.u32 %s1338_s27, 4  ;;  %p1264_p8 = scmp.ne.s32.totalorder %s1658_s3, %s1263_s11  ;;  %s30_s28 = int_to_ptr.vmem [resolvable:$true] %s29_s28 }
  0x15   :  { %p1267_p9 = scmp.lt.u32.totalorder %s1263_s11, %s1658_s3 }
  0x17   :  { %p1269_p10 = pnand %p1267_p9, %p1264_p8 }
  0x19   :  { %1272 = shalt.err (!%p1269_p10)
}
  0x1a   :  { %s1273_s17 = scalar_lea.vmem %s30_s28, 256  ;;  %p1278_p12 = scmp.lt.s32.totalorder %s30_s28, %s30_s28 }
  0x1b   :  { %p1274_p11 = scmp.ne.s32.totalorder %s30_s28, %s1273_s17  ;;  %p1279_p13 = scmp.lt.s32.totalorder %s1273_s17, %s1273_s17 }
  0x1d   :  { %p1280_p0 = por %p1279_p13, %p1278_p12 }
  0x1f   :  { %p1281_p1 = pnand %p1280_p0, %p1274_p11 }
  0x21   :  { %1284 = shalt.err (!%p1281_p1)
}
  0x22   :  { %s1339_s6 = smov 128   ;;  %s1340_s14 = smov 8  }
  0x23   :  { %35 = dma.hbm_to_vmem [thread:$0]  %s1658_s3, 256, %s30_s28, [#allocation3], %s1339_s6, %s1339_s6, %s1340_s14  }
  0x24   :  { %s1341_s20 = smov [#allocation6]   ;;  %s1342_s22 = smov [#allocation7]  }
  0x25   :  { %s59_s21 = sshll.u32 %s1341_s20, 4  ;;  %s71_s25 = sshll.u32 %s1342_s22, 4  ;;  %s60_s21 = int_to_ptr.vmem [resolvable:$true] %s59_s21  ;;  %s1430_s25 = int_to_ptr.vmem [resolvable:$true] %s71_s25 }
  0x26   :  { %s1285_s29 = scalar_lea.hbm %s1663_s8, 256 }
  0x27   :  { %p1286_p2 = scmp.ne.s32.totalorder %s1663_s8, %s1285_s29  ;;  %p1289_p3 = scmp.lt.u32.totalorder %s1285_s29, %s1663_s8 }
  0x29   :  { %p1291_p4 = pnand %p1289_p3, %p1286_p2 }
  0x2b   :  { %1294 = shalt.err (!%p1291_p4)
}
  0x2c   :  { %s1295_s3 = scalar_lea.vmem %s60_s21, 256  ;;  %p1300_p6 = scmp.lt.s32.totalorder %s60_s21, %s60_s21 }
  0x2d   :  { %p1296_p5 = scmp.ne.s32.totalorder %s60_s21, %s1295_s3  ;;  %p1301_p7 = scmp.lt.s32.totalorder %s1295_s3, %s1295_s3 }
  0x2f   :  { %p1302_p8 = por %p1301_p7, %p1300_p6 }
  0x31   :  { %p1303_p9 = pnand %p1302_p8, %p1296_p5 }
  0x33   :  { %1306 = shalt.err (!%p1303_p9)
}
  0x34   :  { %65 = dma.hbm_to_vmem [thread:$0]  %s1663_s8, 256, %s60_s21, [#allocation5], %s1336_s23, %s1336_s23, %s1337_s24  }
  0x35   :  { %s1307_s6 = scalar_lea.hbm %s1664_s9, 768 }
  0x36   :  { %p1308_p10 = scmp.ne.s32.totalorder %s1664_s9, %s1307_s6  ;;  %p1311_p11 = scmp.lt.u32.totalorder %s1307_s6, %s1664_s9 }
  0x38   :  { %p1313_p12 = pnand %p1311_p11, %p1308_p10 }
  0x3a   :  { %1316 = shalt.err (!%p1313_p12)
}
  0x3b   :  { %s1317_s22 = scalar_lea.vmem %s1430_s25, 768  ;;  %p1322_p0 = scmp.lt.s32.totalorder %s1430_s25, %s1430_s25 }
  0x3c   :  { %p1318_p13 = scmp.ne.s32.totalorder %s1430_s25, %s1317_s22  ;;  %p1323_p1 = scmp.lt.s32.totalorder %s1317_s22, %s1317_s22 }
  0x3e   :  { %p1324_p2 = por %p1323_p1, %p1322_p0 }
  0x40   :  { %p1325_p3 = pnand %p1324_p2, %p1318_p13 }
  0x42   :  { %1328 = shalt.err (!%p1325_p3)
}
  0x43   :  { %s1343_s8 = smov 384   ;;  %s1344_s23 = smov 24  }
  0x44   :  { %77 = dma.hbm_to_vmem [thread:$0]  %s1664_s9, 768, %s1430_s25, [#allocation8], %s1343_s8, %s1343_s8, %s1344_s23  }
  0x45   :  { %1329 = dma.done.wait [#allocation3], 256  }
  0x46   :  { %1330 = vsyncadd [#allocation3], 4294967040 }
  0x47   :  { %1331 = dma.done.wait [#allocation5], 512  }
  0x48   :  { %1332 = vsyncadd [#allocation5], 4294966784 }
  0x49   :  { %1333 = dma.done.wait [#allocation8], 768  }
  0x4a   :  { %1334 = vsyncadd [#allocation8], 4294966528  ;;  %v1345_v0 = vmov 0   ;;  %v95_v1 = vld [vmem:[%s1655_s0] sm:$0xff]  ;;  %v112_v3 = vld [vmem:[%s1657_s2 + $0x8] sm:$0xff]  ;;  %v1346_v17 = vmov 0.0   ;;  %v97_v18 = vlaneseq }
  0x4b   :  { %1196 = vset.pattern.permute.xlu0 %v1345_v0  ;;  %292 = vmatprep.mubr.bf16.mxu1 %v1345_v0  ;;  %v111_v2 = vld [vmem:[%s1657_s2] sm:$0xff]  ;;  %v113_v4 = vld [vmem:[%s1657_s2 + $0x10] sm:$0xff]  ;;  %v114_v5 = vld [vmem:[%s1657_s2 + $0x18] sm:$0xff]  ;;  %vm121_vm0 = vcmask 523264   ;;  %vm1347_vm3 = vmmov 0   ;;  %vm256_vm4 = vcmask 261120  }
  0x4c   :  { %100 = vperm.xlu0 %1196, %v95_v1   ;;  %v96_v6 = vld [vmem:[%s1655_s0 + $0x8] sm:$0xff]  ;;  %v1167_v7 = vpack.c.bf16 %v112_v3, %v111_v2  ;;  %v1171_v8 = vpack.c.bf16 %v114_v5, %v113_v4  ;;  %v115_v9 = vld [vmem:[%s1657_s2 + $0x20] sm:$0xff]  ;;  %v117_v11 = vld [vmem:[%s1657_s2 + $0x30] sm:$0xff]  ;;  %v98_v19 = vand.u32 127, %v97_v18  ;;  %v1534_v35 = vshrl.u32 %v97_v18, 7 }
  0x4d   :  { %v116_v10 = vld [vmem:[%s1657_s2 + $0x28] sm:$0xff]  ;;  %v118_v13 = vld [vmem:[%s1657_s2 + $0x38] sm:$0xff]  ;;  %v1197_v14 = vld [vmem:[%s1659_s4 + $0x4] ss:$12 sps:$4 sm:$0xff]   ;;  %vm412_vm5 = vcmask 1043456   ;;  %vm396_vm6 = vcmask 64512  }
  0x4e   :  { %1168 = vmatprep.subr.bf16.mxu0 %v1167_v7  ;;  %v1175_v12 = vpack.c.bf16 %v116_v10, %v115_v9  ;;  %v1199_v15 = vld [vmem:[%s1659_s4] ss:$12 sps:$4 sm:$0xff]   ;;  %260 = vmatprep.subr.bf16.mxu1 %v1197_v14  ;;  %v1179_v16 = vpack.c.bf16 %v118_v13, %v117_v11  ;;  %v1200_v24 = vld [vmem:[%s1659_s4 + $0x1c] ss:$12 sps:$4 sm:$0xff]   ;;  %v1202_v25 = vld [vmem:[%s1659_s4 + $0x18] ss:$12 sps:$4 sm:$0xff]  }
  0x4f   :  { %1170 = vmatpush3.bf16.msra.mxu0 %v1167_v7  ;;  %261 = vmatpush1.bf16.msra.mxu1 %v1199_v15  ;;  %v120_v26 = vld [vmem:[#allocation2 + $0x8] sm:$0xff]  ;;  %v119_v27 = vld [vmem:[#allocation2] sm:$0xff]  ;;  %v214_v36 = vsub.s32 0, %v1534_v35  ;;  %v92_v37 = vld [vmem:[#allocation7 + $0x8] sm:$0xff]  ;;  %v502_v11 = vsub.s32 1, %v1534_v35 }
  0x50   :  { %103 = vperm.xlu0 %1196, %v96_v6   ;;  %1172 = vmatprep.subr.bf16.mxu0 %v1171_v8  ;;  %v1203_v32 = vld [vmem:[%s1659_s4 + $0x8] ss:$12 sps:$4 sm:$0xff]   ;;  %v1204_v34 = vld [vmem:[%s1659_s4 + $0x20] ss:$12 sps:$4 sm:$0xff]  }
  0x51   :  { %262 = vmatprep.subr.bf16.mxu1 %v1200_v24  ;;  %v219_v38 = vrot.slane %v92_v37, %v214_v36  ;;  %v1537_v39 = vld [vmem:[#allocation7] sm:$0xff]  ;;  %v93_v44 = vld [vmem:[#allocation7 + $0x10] sm:$0xff] }
  0x52   :  { %v215_v45 = vrot.slane %v1537_v39, %v214_v36  ;;  %v223_v48 = vrot.slane %v93_v44, %v214_v36  ;;  %v344_v1 = vld [vmem:[%s1656_s1] sm:$0x3]  ;;  %v1207_v37 = vld [vmem:[%s1660_s5 + $0x10] sm:$0xff]  }
  0x53   :  { %1174 = vmatpush3.bf16.msra.mxu0 %v1171_v8  ;;  %263 = vmatpush1.bf16.msra.mxu1 %v1202_v25  ;;  %v1004_v2 = vadd.f32 -1.0, %v344_v1 }
  0x54   :  { %1176 = vmatprep.subr.bf16.mxu0 %v1175_v12  ;;  %1087 = vmatprep.subr.bf16.mxu1 %v1346_v17 }
  0x55   :  { %v346_v3 = vmul.f32 1e+09, %v1004_v2 }
  0x57   :  { %1178 = vmatpush3.bf16.msra.mxu0 %v1175_v12  ;;  %v394_v4 = vrot.slane %v346_v3, %v214_v36  ;;  %v503_v13 = vrot.slane %v346_v3, %v502_v11  ;;  %v1206_v36 = vld [vmem:[%s1660_s5 + $0x8] sm:$0xff]  }
  0x58   :  { %1180 = vmatprep.subr.bf16.mxu0 %v1179_v16 }
  0x5b   :  { %1182 = vmatpush3.bf16.msra.mxu0 %v1179_v16 }
  0x5c   :  { %1095 = vmatprep.subr.bf16.mxu0 %v1346_v17 }
  0xcb   :  { %v101_v20 = vpop.permute.xlu0 %100 }
  0xcc   :  { %vm105_vm1 = vcmp.eq.s32.totalorder %v101_v20, %v98_v19 }
  0xcd   :  { %v992_v21 = vsel %vm105_vm1, 1.0, %v1346_v17 }
  0xce   :  { %1084 = vmatprep.mubr.msk.f32.mxu0 %vm121_vm0, %v992_v21 }
  0xcf   :  { %v104_v22 = vpop.permute.xlu0 %103 }
  0xd0   :  { %vm106_vm2 = vcmp.eq.s32.totalorder %v104_v22, %v98_v19 }
  0xd1   :  { %v993_v23 = vsel %vm106_vm2, 1.0, %v1346_v17 }
  0xd2   :  { %1085 = vmatmul.mubr.msk.f32.vlgmr.msra.gmra.mrb[0].mxu0 %vm121_vm0, %v993_v23 }
  0xd3   :  { %1097 = vmatprep.mubr.msk.bf16.mxu0 %vm1347_vm3, %v1346_v17 }
 0x1a5   :  { %v1086_v28 = vpop.f32.mrb[0].mxu0 }
 0x1a6   :  { %v1514_v29 = vadd.f32 %v1086_v28, %v120_v26  ;;  %v194_v30 = vpop.f32.mrb[1].mxu0 }
 0x1a7   :  { %v1516_v31 = vadd.f32 %v194_v30, %v119_v27 }
 0x1a9   :  { %v203_v33 = vpack.c.bf16 %v1514_v29, %v1516_v31 }
 0x1ab   :  { %1002 = vmatmul.mubr.msk.bf16.vlgmr.msra.gmra.mrb[0].mxu1 %vm256_vm4, %v203_v33 }
 0x1ac   :  { %1088 = vmatpush3.bf16.msra.mxu1 %v1203_v32  ;;  %1091 = vmatprep.mubr.msk.bf16.mxu1 %vm1347_vm3, %v1346_v17 }
 0x1ad   :  { %1089 = vmatprep.subr.bf16.mxu1 %v1346_v17 }
 0x1b0   :  { %1090 = vmatpush3.bf16.msra.mxu1 %v1204_v34  ;;  %v1205_v34 = vld [vmem:[%s1660_s5] sm:$0xff]  }
 0x1b1   :  { %1101 = vmatprep.subr.bf16.mxu1 %v1346_v17 }
 0x1b3   :  { %1092 = vmatmul.mubr.msk.bf16.vlgmr.msra.gmra.mrb[4].mxu1 %vm256_vm4, %v203_v33 }
 0x1b4   :  { %1103 = vmatprep.mubr.msk.bf16.mxu1 %vm1347_vm3, %v1346_v17 }
 0x27e   :  { %v294_v40 = vpop.f32.mrb[0].mxu1 }
 0x27f   :  { %v296_v41 = vpop.f32.mrb[1].mxu1  ;;  %v295_v49 = vadd.f32 %v294_v40, %v215_v45  ;;  %v1209_v40 = vld [vmem:[%s1660_s5 + $0x20] sm:$0xff]  }
 0x280   :  { %v297_v42 = vadd.f32 %v296_v41, %v219_v38  ;;  %v298_v43 = vpop.f32.mrb[2].mxu1 }
 0x281   :  { %v300_v46 = vpop.f32.mrb[3].mxu1  ;;  %v347_v55 = vpack.c.bf16 %v295_v49, %v295_v49  ;;  %v299_v62 = vadd.f32 %v298_v43, %v215_v45  ;;  %v1210_v49 = vld [vmem:[%s1660_s5 + $0x28] sm:$0xff]  }
 0x282   :  { %v348_v47 = vpack.c.bf16 %v297_v42, %v297_v42  ;;  %v301_v50 = vadd.f32 %v300_v46, %v219_v38  ;;  %v1208_v38 = vld [vmem:[%s1660_s5 + $0x18] sm:$0xff]  }
 0x283   :  { %v456_v0 = vpack.c.bf16 %v299_v62, %v299_v62 }
 0x284   :  { %1096 = vmatpush3.bf16.xpose.msra.mxu0 %v348_v47  ;;  %v457_v59 = vpack.c.bf16 %v301_v50, %v301_v50  ;;  %v1211_v50 = vld [vmem:[%s1660_s5 + $0x30] sm:$0xff]  }
 0x285   :  { %1107 = vmatprep.subr.bf16.mxu0 %v1346_v17 }
 0x286   :  { %v337_v51 = vpop.f32.mrb[4].mxu1 }
 0x287   :  { %v338_v52 = vadd.f32 %v337_v51, %v223_v48  ;;  %v1093_v53 = vpop.f32.mrb[5].mxu1  ;;  %v1212_v51 = vld [vmem:[%s1660_s5 + $0x38] sm:$0xff]  }
 0x288   :  { %v340_v54 = vpop.f32.mrb[6].mxu1 }
 0x289   :  { %v349_v56 = vpack.c.bf16 %v338_v52, %v338_v52  ;;  %v341_v57 = vadd.f32 %v340_v54, %v223_v48  ;;  %v1094_v58 = vpop.f32.mrb[7].mxu1 }
 0x28b   :  { %v414_v60 = vsel %vm412_vm5, %v349_v56, 0  ;;  %v458_v61 = vpack.c.bf16 %v341_v57, %v341_v57  ;;  %1098 = vmatmul.mubr.bf16.vlgmr.msra.gmra.mrb[4].mxu0 %v347_v55 }
 0x28c   :  { %1102 = vmatpush3.bf16.msra.mxu1 %v414_v60  ;;  %1108 = vmatpush3.bf16.xpose.msra.mxu0 %v457_v59 }
 0x28d   :  { %v1541_v63 = vsel %vm412_vm5, %v458_v61, 0  ;;  %1109 = vmatprep.mubr.msk.bf16.mxu0 %vm1347_vm3, %v1346_v17  ;;  %1113 = vmatprep.subr.bf16.mxu1 %v1346_v17  ;;  %v583_v61 = vrot.slane %v1537_v39, %v502_v11 }
 0x28e   :  { %1119 = vmatprep.subr.bf16.mxu0 %v1346_v17 }
 0x293   :  { %1110 = vmatmul.mubr.bf16.vlgmr.msra.gmra.mrb[8].mxu0 %v456_v0 }
 0x294   :  { %1135 = vmatprep.mubr.msk.bf16.mxu0 %vm1347_vm3, %v1346_v17  ;;  %1120 = vmatpush3.bf16.msra.mxu0 %v1205_v34 }
 0x295   :  { %1121 = vmatprep.subr.bf16.mxu0 %v1346_v17 }
 0x298   :  { %1122 = vmatpush3.bf16.msra.mxu0 %v1206_v36 }
 0x299   :  { %1123 = vmatprep.subr.bf16.mxu0 %v1346_v17 }
 0x29c   :  { %1124 = vmatpush3.bf16.msra.mxu0 %v1207_v37 }
 0x29d   :  { %1125 = vmatprep.subr.bf16.mxu0 %v1346_v17 }
 0x2a0   :  { %1126 = vmatpush3.bf16.msra.mxu0 %v1208_v38 }
 0x2a1   :  { %1127 = vmatprep.subr.bf16.mxu0 %v1346_v17 }
 0x2a4   :  { %1128 = vmatpush3.bf16.msra.mxu0 %v1209_v40 }
 0x2a5   :  { %1129 = vmatprep.subr.bf16.mxu0 %v1346_v17 }
 0x2a8   :  { %1130 = vmatpush3.bf16.msra.mxu0 %v1210_v49 }
 0x2a9   :  { %1131 = vmatprep.subr.bf16.mxu0 %v1346_v17 }
 0x2ac   :  { %1132 = vmatpush3.bf16.msra.mxu0 %v1211_v50 }
 0x2ad   :  { %1133 = vmatprep.subr.bf16.mxu0 %v1346_v17 }
 0x2b0   :  { %1134 = vmatpush3.bf16.msra.mxu0 %v1212_v51 }
 0x35e   :  { %v384_v5 = vpop.f32.mrb[4].mxu0 }
 0x35f   :  { %v390_v6 = vmul.f32 0.17677669, %v384_v5  ;;  %v1099_v7 = vpop.f32.mrb[5].mxu0 }
 0x360   :  { %v387_v8 = vpop.f32.mrb[6].mxu0 }
 0x361   :  { %v1100_v9 = vpop.f32.mrb[7].mxu0  ;;  %v395_v10 = vadd.f32 %v394_v4, %v390_v6 }
 0x363   :  { %v397_v12 = vsel %vm396_vm6, %v395_v10, -inf }
 0x364   :  { %398 = vmax.xlane.f32.xlu1 %v397_v12 }
 0x366   :  { %v493_v14 = vpop.f32.mrb[8].mxu0 }
 0x367   :  { %v499_v15 = vmul.f32 0.17677669, %v493_v14  ;;  %v1111_v16 = vpop.f32.mrb[9].mxu0 }
 0x368   :  { %v496_v18 = vpop.f32.mrb[10].mxu0 }
 0x369   :  { %v1112_v19 = vpop.f32.mrb[11].mxu0  ;;  %v504_v20 = vadd.f32 %v503_v13, %v499_v15  ;;  %v1213_v18 = vld [vmem:[#allocation4] sm:$0xff]  }
 0x36b   :  { %v505_v21 = vsel %vm396_vm6, %v504_v20, -inf }
 0x36c   :  { %506 = vmax.xlane.f32.xlu1 %v505_v21 }
 0x3f1   :  { %v399_v22 = vpop.xlane.xlu1 %398 }
 0x3f2   :  { %v400_v23 = vsub.f32 %v395_v10, %v399_v22 }
 0x3f4   :  { %v401_v24 = vmul.f32 1.442695, %v400_v23 }
 0x3f6   :  { %1221 = vpow2.f32 %v401_v24 }
 0x3f9   :  { %v507_v25 = vpop.xlane.xlu1 %506 }
 0x3fa   :  { %v508_v26 = vsub.f32 %v504_v20, %v507_v25  ;;  %v704_v25 = vsub.s32 2, %v1534_v35 }
 0x3fc   :  { %v509_v27 = vmul.f32 1.442695, %v508_v26 }
 0x3fe   :  { %1223 = vpow2.f32 %v509_v27  ;;  %v705_v27 = vrot.slane %v1537_v39, %v704_v25 }
 0x400   :  { %v1222_v28 = vpop.eup %1221 }
 0x401   :  { %v403_v30 = vsel %vm396_vm6, %v1222_v28, 0.0 }
 0x402   :  { %404 = vadd.xlane.f32.xlu0 %v403_v30  ;;  %v710_v30 = vsub.s32 3, %v1534_v35 }
 0x404   :  { %v711_v36 = vrot.slane %v1537_v39, %v710_v30 }
 0x408   :  { %v1224_v32 = vpop.eup %1223 }
 0x409   :  { %v511_v33 = vsel %vm396_vm6, %v1224_v32, 0.0 }
 0x40a   :  { %512 = vadd.xlane.f32.xlu1 %v511_v33 }
 0x48f   :  { %v405_v41 = vpop.xlane.xlu0 %404 }
 0x490   :  { %1225 = vrcp.f32 %v405_v41 }
 0x497   :  { %v513_v42 = vpop.xlane.xlu1 %512 }
 0x498   :  { %1227 = vrcp.f32 %v513_v42  ;;  %v1215_v42 = vld [vmem:[%s1662_s7] sm:$0xff]  }
 0x49a   :  { %v1226_v43 = vpop.eup %1225 }
 0x49b   :  { %v407_v44 = vmul.f32 %v1226_v43, %v1222_v28  ;;  %v1216_v43 = vld [vmem:[%s1662_s7 + $0x8] sm:$0xff]  }
 0x49d   :  { %v408_v45 = vpack.c.bf16 %v407_v44, %v407_v44  ;;  %v1217_v44 = vld [vmem:[%s1662_s7 + $0x10] sm:$0xff]  }
 0x49f   :  { %1104 = vmatmul.mubr.msk.bf16.vlgmr.msra.gmra.mrb[8].mxu1 %vm396_vm6, %v408_v45  ;;  %v1218_v45 = vld [vmem:[%s1662_s7 + $0x18] sm:$0xff]  }
 0x4a0   :  { %1114 = vmatpush3.bf16.msra.mxu1 %v1541_v63  ;;  %1115 = vmatprep.mubr.msk.bf16.mxu1 %vm1347_vm3, %v1346_v17 }
 0x4a1   :  { %1139 = vmatprep.subr.bf16.mxu1 %v1346_v17 }
 0x4a2   :  { %v1228_v46 = vpop.eup %1227 }
 0x4a3   :  { %v515_v47 = vmul.f32 %v1228_v46, %v1224_v32  ;;  %v721_v46 = vsub.s32 7, %v1534_v35 }
 0x4a5   :  { %v516_v48 = vpack.c.bf16 %v515_v47, %v515_v47  ;;  %v722_v47 = vrot.slane %v1537_v39, %v721_v46  ;;  %v914_v46 = vsub.s32 5, %v1534_v35 }
 0x4a7   :  { %1116 = vmatmul.mubr.msk.bf16.vlgmr.msra.gmra.mrb[12].mxu1 %vm396_vm6, %v516_v48 }
 0x4a8   :  { %1143 = vmatprep.mubr.msk.bf16.mxu1 %vm1347_vm3, %v1346_v17  ;;  %1140 = vmatpush3.bf16.msra.mxu1 %v1213_v18 }
 0x4a9   :  { %1141 = vmatprep.subr.bf16.mxu1 %v1346_v17 }
 0x572   :  { %v450_v52 = vpop.f32.mrb[8].mxu1 }
 0x573   :  { %v1105_v53 = vpop.f32.mrb[9].mxu1 }
 0x574   :  { %v453_v54 = vpop.f32.mrb[10].mxu1 }
 0x575   :  { %v1106_v55 = vpop.f32.mrb[11].mxu1 }
 0x57a   :  { %v557_v56 = vpop.f32.mrb[12].mxu1 }
 0x57b   :  { %v563_v57 = vpack.c.bf16 %v557_v56, %v450_v52  ;;  %v1117_v58 = vpop.f32.mrb[13].mxu1 }
 0x57c   :  { %v560_v59 = vpop.f32.mrb[14].mxu1 }
 0x57d   :  { %v1118_v60 = vpop.f32.mrb[15].mxu1  ;;  %1136 = vmatmul.mubr.bf16.vlgmr.msra.gmra.mrb[12].mxu0 %v563_v57 }
 0x650   :  { %v666_v62 = vpop.f32.mrb[12].mxu0 }
 0x651   :  { %v667_v63 = vadd.f32 %v666_v62, %v583_v61  ;;  %v1137_v0 = vpop.f32.mrb[13].mxu0 }
 0x652   :  { %v669_v1 = vpop.f32.mrb[14].mxu0 }
 0x653   :  { %v670_v2 = vadd.f32 %v669_v1, %v583_v61  ;;  %v1138_v3 = vpop.f32.mrb[15].mxu0  ;;  %v673_v4 = vadd.f32 %v667_v63, %v1516_v31 }
 0x655   :  { %v675_v5 = vsel %vm256_vm4, %v673_v4, 0.0  ;;  %v674_v6 = vadd.f32 %v670_v2, %v1514_v29  ;;  %v1214_v29 = vld [vmem:[#allocation4 + $0x8] sm:$0xff]  }
 0x656   :  { %676 = vadd.xlane.f32.xlu1 %v675_v5  ;;  %1142 = vmatpush3.bf16.msra.mxu1 %v1214_v29 }
 0x657   :  { %v678_v7 = vsel %vm256_vm4, %v674_v6, 0.0  ;;  %1147 = vmatprep.subr.bf16.mxu1 %v1346_v17 }
 0x65a   :  { %679 = vadd.xlane.f32.xlu1 %v678_v7 }
 0x6e3   :  { %v677_v8 = vpop.xlane.xlu1 %676 }
 0x6e4   :  { %v682_v9 = vmul.f32 0.03125, %v677_v8 }
 0x6e6   :  { %v684_v10 = vsub.f32 %v673_v4, %v682_v9  ;;  %v808_v9 = vsub.s32 6, %v1534_v35 }
 0x6e7   :  { %v680_v11 = vpop.xlane.xlu1 %679 }
 0x6e8   :  { %v683_v12 = vmul.f32 0.03125, %v680_v11  ;;  %v686_v13 = vmul.f32 %v684_v10, %v684_v10 }
 0x6ea   :  { %v685_v14 = vsub.f32 %v674_v6, %v683_v12  ;;  %v688_v15 = vsel %vm256_vm4, %v686_v13, 0.0 }
 0x6eb   :  { %689 = vadd.xlane.f32.xlu1 %v688_v15 }
 0x6ec   :  { %v687_v16 = vmul.f32 %v685_v14, %v685_v14 }
 0x6ee   :  { %v691_v31 = vsel %vm256_vm4, %v687_v16, 0.0 }
 0x6ef   :  { %692 = vadd.xlane.f32.xlu1 %v691_v31 }
 0x778   :  { %v690_v19 = vpop.xlane.xlu1 %689 }
 0x779   :  { %v694_v20 = vmul.f32 0.03125, %v690_v19 }
 0x77b   :  { %v696_v21 = vadd.f32 1e-05, %v694_v20 }
 0x77c   :  { %v693_v22 = vpop.xlane.xlu1 %692 }
 0x77d   :  { %1229 = vrsqrt.f32 %v696_v21  ;;  %v695_v23 = vmul.f32 0.03125, %v693_v22 }
 0x77f   :  { %v697_v24 = vadd.f32 1e-05, %v695_v23 }
 0x781   :  { %1231 = vrsqrt.f32 %v697_v24 }
 0x787   :  { %v1230_v26 = vpop.eup %1229 }
 0x788   :  { %v700_v28 = vmul.f32 %v1230_v26, %v684_v10  ;;  %v809_v10 = vrot.slane %v1537_v39, %v808_v9 }
 0x78a   :  { %v706_v33 = vmul.f32 %v705_v27, %v700_v28 }
 0x78b   :  { %v1232_v32 = vpop.eup %1231 }
 0x78c   :  { %v701_v34 = vmul.f32 %v1232_v32, %v685_v14  ;;  %v712_v38 = vadd.f32 %v711_v36, %v706_v33  ;;  %v1219_v32 = vld [vmem:[#allocation6] sm:$0xff]   ;;  %v1220_v33 = vld [vmem:[#allocation6 + $0x8] sm:$0xff]  }
 0x78e   :  { %v707_v37 = vmul.f32 %v705_v27, %v701_v34 }
 0x790   :  { %v713_v40 = vadd.f32 %v711_v36, %v707_v37 }
 0x792   :  { %v714_v41 = vpack.c.bf16 %v713_v40, %v712_v38 }
 0x794   :  { %1144 = vmatmul.mubr.msk.bf16.vlgmr.msra.gmra.mrb[16].mxu1 %vm256_vm4, %v714_v41 }
 0x795   :  { %1155 = vmatprep.mubr.msk.bf16.mxu1 %vm1347_vm3, %v1346_v17  ;;  %1148 = vmatpush3.bf16.msra.mxu1 %v1215_v42  ;;  %v908_v42 = vsub.s32 4, %v1534_v35 }
 0x796   :  { %1149 = vmatprep.subr.bf16.mxu1 %v1346_v17 }
 0x799   :  { %1150 = vmatpush3.bf16.msra.mxu1 %v1216_v43 }
 0x79a   :  { %1151 = vmatprep.subr.bf16.mxu1 %v1346_v17 }
 0x79d   :  { %1152 = vmatpush3.bf16.msra.mxu1 %v1217_v44  ;;  %v909_v44 = vrot.slane %v1537_v39, %v908_v42 }
 0x79e   :  { %1153 = vmatprep.subr.bf16.mxu1 %v1346_v17 }
 0x7a1   :  { %1154 = vmatpush3.bf16.msra.mxu1 %v1218_v45 }
 0x7a2   :  { %1159 = vmatprep.subr.bf16.mxu1 %v1346_v17 }
 0x867   :  { %v772_v48 = vpop.f32.mrb[16].mxu1 }
 0x868   :  { %v773_v49 = vadd.f32 %v772_v48, %v722_v47  ;;  %v1145_v50 = vpop.f32.mrb[17].mxu1 }
 0x869   :  { %v775_v51 = vpop.f32.mrb[18].mxu1 }
 0x86a   :  { %v779_v52 = vmul.f32 %v773_v49, %v773_v49  ;;  %v776_v53 = vadd.f32 %v775_v51, %v722_v47  ;;  %v1146_v54 = vpop.f32.mrb[19].mxu1 }
 0x86b   :  { %v1023_v54 = vld [vmem:[#allocation7 + $0x18] ss:$0 sm:$0xff] }
 0x86c   :  { %v781_v55 = vmul.f32 %v779_v52, %v773_v49  ;;  %v780_v56 = vmul.f32 %v776_v53, %v776_v53 }
 0x86e   :  { %v783_v57 = vmul.f32 0.044715, %v781_v55  ;;  %v782_v58 = vmul.f32 %v780_v56, %v776_v53 }
 0x870   :  { %v785_v59 = vadd.f32 %v783_v57, %v773_v49  ;;  %v784_v60 = vmul.f32 0.044715, %v782_v58 }
 0x872   :  { %v787_v61 = vmul.f32 0.7978846, %v785_v59  ;;  %v786_v62 = vadd.f32 %v784_v60, %v776_v53 }
 0x874   :  { %1233 = vtanh.f32 %v787_v61  ;;  %v788_v63 = vmul.f32 0.7978846, %v786_v62 }
 0x876   :  { %1235 = vtanh.f32 %v788_v63 }
 0x87e   :  { %v1234_v0 = vpop.eup %1233 }
 0x87f   :  { %v791_v1 = vadd.f32 1.0, %v1234_v0 }
 0x880   :  { %v1236_v2 = vpop.eup %1235 }
 0x881   :  { %v793_v3 = vmul.f32 0.5, %v791_v1  ;;  %v792_v4 = vadd.f32 1.0, %v1236_v2 }
 0x883   :  { %v794_v5 = vmul.f32 0.5, %v792_v4  ;;  %v795_v6 = vmul.f32 %v793_v3, %v773_v49  ;;  %v915_v49 = vrot.slane %v1537_v39, %v914_v46 }
 0x885   :  { %v796_v7 = vmul.f32 %v794_v5, %v776_v53 }
 0x887   :  { %v797_v8 = vpack.c.bf16 %v796_v7, %v795_v6 }
 0x889   :  { %1156 = vmatmul.mubr.msk.bf16.vlgmr.msra.gmra.mrb[20].mxu1 %vm121_vm0, %v797_v8 }
 0x88a   :  { %1163 = vmatprep.mubr.msk.bf16.mxu1 %vm1347_vm3, %v1346_v17  ;;  %1160 = vmatpush3.bf16.msra.mxu1 %v1219_v32 }
 0x88b   :  { %1161 = vmatprep.subr.bf16.mxu1 %v1346_v17 }
 0x88e   :  { %1162 = vmatpush3.bf16.msra.mxu1 %v1220_v33 }
 0x95c   :  { %v871_v11 = vpop.f32.mrb[20].mxu1 }
 0x95d   :  { %v872_v12 = vadd.f32 %v871_v11, %v809_v10  ;;  %v1157_v13 = vpop.f32.mrb[21].mxu1 }
 0x95e   :  { %v874_v14 = vpop.f32.mrb[22].mxu1 }
 0x95f   :  { %v875_v15 = vadd.f32 %v874_v14, %v809_v10  ;;  %v1158_v16 = vpop.f32.mrb[23].mxu1  ;;  %v878_v31 = vadd.f32 %v872_v12, %v712_v38 }
 0x961   :  { %v880_v18 = vsel %vm256_vm4, %v878_v31, 0.0  ;;  %v879_v29 = vadd.f32 %v875_v15, %v713_v40 }
 0x962   :  { %881 = vadd.xlane.f32.xlu1 %v880_v18 }
 0x963   :  { %v883_v19 = vsel %vm256_vm4, %v879_v29, 0.0 }
 0x966   :  { %884 = vadd.xlane.f32.xlu1 %v883_v19 }
 0x9ef   :  { %v882_v20 = vpop.xlane.xlu1 %881 }
 0x9f0   :  { %v886_v21 = vmul.f32 0.03125, %v882_v20 }
 0x9f2   :  { %v888_v22 = vsub.f32 %v878_v31, %v886_v21 }
 0x9f3   :  { %v885_v23 = vpop.xlane.xlu1 %884 }
 0x9f4   :  { %v887_v24 = vmul.f32 0.03125, %v885_v23  ;;  %v890_v25 = vmul.f32 %v888_v22, %v888_v22 }
 0x9f6   :  { %v889_v26 = vsub.f32 %v879_v29, %v887_v24  ;;  %v892_v27 = vsel %vm256_vm4, %v890_v25, 0.0 }
 0x9f7   :  { %893 = vadd.xlane.f32.xlu1 %v892_v27 }
 0x9f8   :  { %v891_v28 = vmul.f32 %v889_v26, %v889_v26 }
 0x9fa   :  { %v895_v30 = vsel %vm256_vm4, %v891_v28, 0.0 }
 0x9fb   :  { %896 = vadd.xlane.f32.xlu0 %v895_v30 }
 0xa84   :  { %v894_v34 = vpop.xlane.xlu1 %893 }
 0xa85   :  { %v898_v36 = vmul.f32 0.03125, %v894_v34 }
 0xa87   :  { %v900_v37 = vadd.f32 1e-05, %v898_v36 }
 0xa88   :  { %v897_v38 = vpop.xlane.xlu0 %896 }
 0xa89   :  { %1237 = vrsqrt.f32 %v900_v37  ;;  %v899_v40 = vmul.f32 0.03125, %v897_v38 }
 0xa8b   :  { %v901_v41 = vadd.f32 1e-05, %v899_v40 }
 0xa8d   :  { %1239 = vrsqrt.f32 %v901_v41 }
 0xa93   :  { %v1238_v43 = vpop.eup %1237 }
 0xa94   :  { %v904_v45 = vmul.f32 %v1238_v43, %v888_v22 }
 0xa96   :  { %v910_v48 = vmul.f32 %v909_v44, %v904_v45 }
 0xa97   :  { %v1240_v47 = vpop.eup %1239 }
 0xa98   :  { %v905_v17 = vmul.f32 %v1240_v47, %v889_v26  ;;  %v916_v51 = vadd.f32 %v915_v49, %v910_v48 }
 0xa9a   :  { %v911_v50 = vmul.f32 %v909_v44, %v905_v17 }
 0xa9c   :  { %v917_v52 = vadd.f32 %v915_v49, %v911_v50 }
 0xa9e   :  { %v918_v53 = vpack.c.bf16 %v917_v52, %v916_v51 }
 0xaa0   :  { %1164 = vmatmul.mubr.msk.bf16.vlgmr.msra.gmra.mrb[24].mxu1 %vm256_vm4, %v918_v53 }
 0xb73   :  { %v976_v55 = vpop.f32.mrb[24].mxu1 }
 0xb74   :  { %v977_v56 = vadd.f32 %v1023_v54, %v976_v55  ;;  %v1165_v57 = vpop.f32.mrb[25].mxu1 }
 0xb75   :  { %v979_v58 = vpop.f32.mrb[26].mxu1 }
 0xb76   :  { %983 = vst [vmem:[%s1665_s10] sm:$0xff] %v977_v56  ;;  %v980_v35 = vadd.f32 %v1023_v54, %v979_v58  ;;  %v1166_v59 = vpop.f32.mrb[27].mxu1 }
 0xb78   :  { %984 = vst [vmem:[%s1665_s10 + $0x8] sm:$0xff] %v980_v35 }
 0xb79   :  { %989 = vsyncpa [#allocation3], 1 }
 0xb7a   :  { %990 = vsyncpa [#allocation5], 1 }
 0xb7b   :  { %991 = vsyncpa [#allocation8], 1 }

</bundles_post_ra>
